<compile_context>
chip_gen: v6e
topology: v6e:2x2x1
jax: 0.10.0
libtpu: 0.0.40
codegen_flags: <defaults>
</compile_context>

<pallas_src>
import functools

import numpy as np
import jax
import jax.numpy as jnp
from jax.experimental import pallas as pl
from jax.experimental.pallas import tpu as pltpu


def _round_up(n: int, m: int) -> int:
    return ((n + m - 1) // m) * m


def _lane_pad(d: int) -> int:
    return max(128, _round_up(d, 128))


# --------------------------------------------------------------------------
# Kernel: fused trunk + block-diagonal (mean|logvar) head stack.
# x_ref: (B_pad, D), w_ref: (L, D, D), b_ref: (L, 1, D), out_ref: (B_pad, D)
# --------------------------------------------------------------------------
def _encoder_kernel(x_ref, w_ref, b_ref, out_ref, *, n_layers, activation):
    def act(v):
        if activation == "relu":
            return jnp.maximum(v, 0.0)
        return jnp.tanh(v)

    h = x_ref[...].astype(jnp.float32)
    for i in range(n_layers):                 # static unroll over the stack
        y = b_ref[i] + jnp.dot(h, w_ref[i], preferred_element_type=jnp.float32)
        h = act(y) if i < n_layers - 1 else y  # no activation on final level
    out_ref[...] = h.astype(out_ref.dtype)


# --------------------------------------------------------------------------
# One-time parameter preparation: pad, fuse heads (block-diagonal), stack.
# --------------------------------------------------------------------------
def prepare_encoder_params(params):
    """Pads/fuses/stacks the encoder weights ONCE. Returns a pack dict.

    params: dict with 'share', 'mean', 'logvar' lists of (W(in,out), b(1,out)).
    """
    share = list(params["share"])
    mean_p = list(params["mean"])
    logvar_p = list(params["logvar"])
    if len(mean_p) != len(logvar_p):
        # TODO(synk): support unequal-depth mean/logvar heads (run them as
        # separate sub-stacks instead of one block-diagonal fused stack).
        raise NotImplementedError("fused head path requires equal-depth heads")

    n_share, n_head = len(share), len(mean_p)
    input_dim = (share[0][0].shape[0] if n_share else mean_p[0][0].shape[0])
    output_dim = mean_p[-1][0].shape[1]

    # --- compute the uniform padded width D --------------------------------
    dims = [input_dim] + [int(w.shape[1]) for (w, _) in share]
    halves = []
    for (wm, _), (wv, _) in zip(mean_p, logvar_p):
        half = _lane_pad(int(wm.shape[1]))       # logvar block column offset
        halves.append(half)
        dims.append(half + int(wv.shape[1]))
    D = _lane_pad(max(dims))

    n_layers = n_share + n_head
    w_stack = np.zeros((n_layers, D, D), np.float32)
    b_stack = np.zeros((n_layers, 1, D), np.float32)

    def put_bias(idx, col0, b):
        b = np.asarray(b, np.float32).reshape(-1)
        b_stack[idx, 0, col0:col0 + b.shape[0]] = b

    idx = 0
    # shared trunk layers
    for (w, b) in share:
        w = np.asarray(w, np.float32)
        w_stack[idx, :w.shape[0], :w.shape[1]] = w
        put_bias(idx, 0, b)
        idx += 1

    # fused (block-diagonal) mean|logvar head levels
    prev_half = 0
    for j, ((wm, bm), (wv, bv)) in enumerate(zip(mean_p, logvar_p)):
        half = halves[j]
        wm = np.asarray(wm, np.float32)
        wv = np.asarray(wv, np.float32)
        # mean block: rows [0:in_m), cols [0:out_m)
        w_stack[idx, :wm.shape[0], :wm.shape[1]] = wm
        put_bias(idx, 0, bm)
        # logvar block: rows start at 0 (level 0 shares the trunk input),
        # else at the previous level's logvar column offset
        row0 = 0 if j == 0 else prev_half
        w_stack[idx, row0:row0 + wv.shape[0], half:half + wv.shape[1]] = wv
        put_bias(idx, half, bv)
        prev_half = half
        idx += 1

    return {
        "w_stack": jnp.asarray(w_stack),
        "b_stack": jnp.asarray(b_stack),
        "D": D,
        "n_layers": n_layers,
        "input_dim": input_dim,
        "output_dim": output_dim,
        "logvar_col0": halves[-1],
    }


# --------------------------------------------------------------------------
# Forward wrapper
# --------------------------------------------------------------------------
def encoder_forward(x, pack, activation: str = "relu"):
    """Runs the fused Pallas encoder. Returns (mean, logvar).

    x: (B, input_dim) float32; pack: output of prepare_encoder_params.
    """
    assert activation in ("relu", "tanh")
    batch, input_dim = x.shape
    assert input_dim == pack["input_dim"]
    D = pack["D"]
    n_layers = pack["n_layers"]

    batch_pad = max(8, _round_up(batch, 8))          # f32 sublane multiple
    x_pad = jnp.pad(x, ((0, batch_pad - batch), (0, D - input_dim)))

    # Right-sized VMEM budget (footprint x2 + headroom), not all of v7x's VMEM.
    footprint = 4 * (2 * batch_pad * D            # x + fused output
                     + n_layers * D * D           # weight stack
                     + n_layers * 8 * D)          # bias stack (sublane-padded)
    vmem_limit = 2 * footprint + (4 << 20)

    kernel = functools.partial(_encoder_kernel, n_layers=n_layers,
                               activation=activation)
    vmem = pl.BlockSpec(memory_space=pltpu.MemorySpace.VMEM)

    fused = pl.pallas_call(
        kernel,
        out_shape=jax.ShapeDtypeStruct((batch_pad, D), x.dtype),
        in_specs=[vmem, vmem, vmem],
        out_specs=vmem,
        compiler_params=pltpu.CompilerParams(vmem_limit_bytes=vmem_limit),
    )(x_pad, pack["w_stack"], pack["b_stack"])

    od = pack["output_dim"]
    c0 = pack["logvar_col0"]
    return fused[:batch, :od], fused[:batch, c0:c0 + od]


# --------------------------------------------------------------------------
# Parameter init (mimics nn.Linear default init) and pure-JAX reference
# --------------------------------------------------------------------------
def init_encoder_params(key, input_dim, output_dim, share_layer_dims,
                        mean_layer_dims, logvar_layer_dims):
    """Weights stored as (in, out) so a layer is y = x @ W + b."""
    def make_stack(key, dims):
        stack = []
        for i in range(len(dims) - 1):
            fan_in, fan_out = dims[i], dims[i + 1]
            key, kw, kb = jax.random.split(key, 3)
            bound = 1.0 / jnp.sqrt(jnp.float32(fan_in))
            w = jax.random.uniform(kw, (fan_in, fan_out), jnp.float32,
                                   -bound, bound)
            b = jax.random.uniform(kb, (1, fan_out), jnp.float32,
                                   -bound, bound)
            stack.append((w, b))
        return key, stack

    share_dims = [input_dim] + list(share_layer_dims)
    key, share = make_stack(key, share_dims)
    trunk_out = share_dims[-1]
    key, mean_stack = make_stack(
        key, [trunk_out] + list(mean_layer_dims) + [output_dim])
    key, logvar_stack = make_stack(
        key, [trunk_out] + list(logvar_layer_dims) + [output_dim])
    return {"share": share, "mean": mean_stack, "logvar": logvar_stack}


def encoder_reference(x, params, activation: str = "relu"):
    """Pure-JAX reference matching Encoder.forward."""
    act = jax.nn.relu if activation == "relu" else jnp.tanh
    h = x
    for (w, b) in params["share"]:
        h = act(h @ w + b)
    m = h
    for (w, b) in params["mean"][:-1]:
        m = act(m @ w + b)
    w, b = params["mean"][-1]
    m = m @ w + b
    v = h
    for (w, b) in params["logvar"][:-1]:
        v = act(v @ w + b)
    w, b = params["logvar"][-1]
    v = v @ w + b
    return m, v


if __name__ == "__main__":
    # Encoder(input_dim=8, output_dim=4, share_layer_dims=[32, 32],
    #         mean_layer_dims=[32], logvar_layer_dims=[32], activation='relu')
    input_dim, output_dim = 8, 4
    share_layer_dims = [32, 32]
    mean_layer_dims = [32]
    logvar_layer_dims = [32]
    batch = 2

    key = jax.random.PRNGKey(0)
    key, kx = jax.random.split(key)
    x = jax.random.normal(kx, (batch, input_dim), jnp.float32)
    params = init_encoder_params(key, input_dim, output_dim, share_layer_dims,
                                 mean_layer_dims, logvar_layer_dims)

    pack = prepare_encoder_params(params)          # one-time pad/fuse/stack

    mean, logvar = encoder_forward(x, pack, activation="relu")
    mean, logvar = jax.block_until_ready((mean, logvar))

    mean_ref, logvar_ref = encoder_reference(x, params, activation="relu")
    assert mean.shape == (batch, output_dim)
    assert logvar.shape == (batch, output_dim)
    assert jnp.allclose(mean, mean_ref, atol=1e-5, rtol=1e-5)
    assert jnp.allclose(logvar, logvar_ref, atol=1e-5, rtol=1e-5)

    print("KERNEL_OK")
</pallas_src>

<mosaic_0001>
module attributes {stable_mosaic.version = 11 : i64} {
  func.func @_encoder_kernel(%arg0: memref<8x256xf32, #tpu.memory_space<vmem>>, %arg1: memref<4x256x256xf32, #tpu.memory_space<vmem>>, %arg2: memref<4x1x256xf32, #tpu.memory_space<vmem>>, %arg3: memref<8x256xf32, #tpu.memory_space<vmem>>) attributes {dimension_semantics = [], scalar_prefetch = 0 : i64, scratch_operands = 0 : i64, tpu.core_type = #tpu.core_type<tc>} {
    %c0 = arith.constant 0 : index
    %c0_0 = arith.constant 0 : index
    %0 = vector.load %arg0[%c0, %c0_0] : memref<8x256xf32, #tpu.memory_space<vmem>>, vector<8x256xf32>
    %c0_1 = arith.constant 0 : index
    %c0_2 = arith.constant 0 : index
    %c0_3 = arith.constant 0 : index
    %1 = vector.load %arg2[%c0_1, %c0_2, %c0_3] : memref<4x1x256xf32, #tpu.memory_space<vmem>>, vector<1x1x256xf32>
    %2 = vector.shape_cast %1 : vector<1x1x256xf32> to vector<1x256xf32>
    %c0_4 = arith.constant 0 : index
    %c0_5 = arith.constant 0 : index
    %c0_6 = arith.constant 0 : index
    %3 = vector.load %arg1[%c0_4, %c0_5, %c0_6] : memref<4x256x256xf32, #tpu.memory_space<vmem>>, vector<1x256x256xf32>
    %4 = vector.shape_cast %3 : vector<1x256x256xf32> to vector<256x256xf32>
    %cst = arith.constant dense<0.000000e+00> : vector<8x256xf32>
    %5 = tpu.matmul %0, %4, %cst {dimension_numbers = #tpu.dot_dimension_numbers<[1], [0], [0], [1], [0, 0, 1, 1], [], []>} : vector<8x256xf32>, vector<256x256xf32>, vector<8x256xf32> -> vector<8x256xf32>
    %6 = vector.broadcast %2 : vector<1x256xf32> to vector<8x256xf32>
    %7 = arith.addf %6, %5 : vector<8x256xf32>
    %cst_7 = arith.constant 0.000000e+00 : f32
    %8 = vector.broadcast %cst_7 : f32 to vector<8x256xf32>
    %9 = arith.maximumf %7, %8 : vector<8x256xf32>
    %c1 = arith.constant 1 : index
    %c0_8 = arith.constant 0 : index
    %c0_9 = arith.constant 0 : index
    %10 = vector.load %arg2[%c1, %c0_8, %c0_9] : memref<4x1x256xf32, #tpu.memory_space<vmem>>, vector<1x1x256xf32>
    %11 = vector.shape_cast %10 : vector<1x1x256xf32> to vector<1x256xf32>
    %c1_10 = arith.constant 1 : index
    %c0_11 = arith.constant 0 : index
    %c0_12 = arith.constant 0 : index
    %12 = vector.load %arg1[%c1_10, %c0_11, %c0_12] : memref<4x256x256xf32, #tpu.memory_space<vmem>>, vector<1x256x256xf32>
    %13 = vector.shape_cast %12 : vector<1x256x256xf32> to vector<256x256xf32>
    %cst_13 = arith.constant dense<0.000000e+00> : vector<8x256xf32>
    %14 = tpu.matmul %9, %13, %cst_13 {dimension_numbers = #tpu.dot_dimension_numbers<[1], [0], [0], [1], [0, 0, 1, 1], [], []>} : vector<8x256xf32>, vector<256x256xf32>, vector<8x256xf32> -> vector<8x256xf32>
    %15 = vector.broadcast %11 : vector<1x256xf32> to vector<8x256xf32>
    %16 = arith.addf %15, %14 : vector<8x256xf32>
    %cst_14 = arith.constant 0.000000e+00 : f32
    %17 = vector.broadcast %cst_14 : f32 to vector<8x256xf32>
    %18 = arith.maximumf %16, %17 : vector<8x256xf32>
    %c2 = arith.constant 2 : index
    %c0_15 = arith.constant 0 : index
    %c0_16 = arith.constant 0 : index
    %19 = vector.load %arg2[%c2, %c0_15, %c0_16] : memref<4x1x256xf32, #tpu.memory_space<vmem>>, vector<1x1x256xf32>
    %20 = vector.shape_cast %19 : vector<1x1x256xf32> to vector<1x256xf32>
    %c2_17 = arith.constant 2 : index
    %c0_18 = arith.constant 0 : index
    %c0_19 = arith.constant 0 : index
    %21 = vector.load %arg1[%c2_17, %c0_18, %c0_19] : memref<4x256x256xf32, #tpu.memory_space<vmem>>, vector<1x256x256xf32>
    %22 = vector.shape_cast %21 : vector<1x256x256xf32> to vector<256x256xf32>
    %cst_20 = arith.constant dense<0.000000e+00> : vector<8x256xf32>
    %23 = tpu.matmul %18, %22, %cst_20 {dimension_numbers = #tpu.dot_dimension_numbers<[1], [0], [0], [1], [0, 0, 1, 1], [], []>} : vector<8x256xf32>, vector<256x256xf32>, vector<8x256xf32> -> vector<8x256xf32>
    %24 = vector.broadcast %20 : vector<1x256xf32> to vector<8x256xf32>
    %25 = arith.addf %24, %23 : vector<8x256xf32>
    %cst_21 = arith.constant 0.000000e+00 : f32
    %26 = vector.broadcast %cst_21 : f32 to vector<8x256xf32>
    %27 = arith.maximumf %25, %26 : vector<8x256xf32>
    %c3 = arith.constant 3 : index
    %c0_22 = arith.constant 0 : index
    %c0_23 = arith.constant 0 : index
    %28 = vector.load %arg2[%c3, %c0_22, %c0_23] : memref<4x1x256xf32, #tpu.memory_space<vmem>>, vector<1x1x256xf32>
    %29 = vector.shape_cast %28 : vector<1x1x256xf32> to vector<1x256xf32>
    %c3_24 = arith.constant 3 : index
    %c0_25 = arith.constant 0 : index
    %c0_26 = arith.constant 0 : index
    %30 = vector.load %arg1[%c3_24, %c0_25, %c0_26] : memref<4x256x256xf32, #tpu.memory_space<vmem>>, vector<1x256x256xf32>
    %31 = vector.shape_cast %30 : vector<1x256x256xf32> to vector<256x256xf32>
    %cst_27 = arith.constant dense<0.000000e+00> : vector<8x256xf32>
    %32 = tpu.matmul %27, %31, %cst_27 {dimension_numbers = #tpu.dot_dimension_numbers<[1], [0], [0], [1], [0, 0, 1, 1], [], []>} : vector<8x256xf32>, vector<256x256xf32>, vector<8x256xf32> -> vector<8x256xf32>
    %33 = vector.broadcast %29 : vector<1x256xf32> to vector<8x256xf32>
    %34 = arith.addf %33, %32 : vector<8x256xf32>
    %c0_28 = arith.constant 0 : index
    %c0_29 = arith.constant 0 : index
    %35 = vector.load %arg3[%c0_28, %c0_29] : memref<8x256xf32, #tpu.memory_space<vmem>>, vector<8x256xf32>
    tpu.vector_store %arg3[%c0_28, %c0_29], %34 {strides = array<i32>} : memref<8x256xf32, #tpu.memory_space<vmem>>, vector<8x256xf32>,
    return
  }
}

</mosaic_0001>

<bundles_post_ra>
// kernel: tpu_custom_call.1
= control target key start
LH: loop header
LB: loop body
LE: loop exit
PB: predicated region body
PF: predicated region fallthrough
CT: control target
= control target key end

     0   :  { %8 = vsyncpa [#allocation3], 0  ;;  %s828_s0 = inlined_call_operand.hbm [shape: f32[8,256], index: 0, kind: input, shape index: {}]   ;;  %s829_s1 = inlined_call_operand.hbm [shape: f32[4,256,256], index: 1, kind: input, shape index: {}]   ;;  %s830_s2 = inlined_call_operand.hbm [shape: f32[4,1,256], index: 2, kind: input, shape index: {}]   ;;  %s831_s3 = inlined_call_operand.hbm [shape: f32[8,256], index: 3, kind: output, shape index: {}]  }
   0x1   :  { %9 = vsyncpa [#allocation6], 0 }
   0x2   :  { %10 = vsyncpa [#allocation4], 0  ;;  %s776_s12 = smov [#allocation5]  }
   0x3   :  { %s26_s13 = sshll.u32 %s776_s12, 4  ;;  %s27_s13 = int_to_ptr.vmem [resolvable:$true] %s26_s13 }
   0x4   :  { %s698_s14 = scalar_lea.vmem %s27_s13, 32768  ;;  %p703_p1 = scmp.lt.s32.totalorder %s27_s13, %s27_s13 }
   0x5   :  { %p699_p0 = scmp.ne.s32.totalorder %s27_s13, %s698_s14  ;;  %p704_p2 = scmp.lt.s32.totalorder %s698_s14, %s698_s14 }
   0x7   :  { %p705_p3 = por %p704_p2, %p703_p1 }
   0x9   :  { %p706_p4 = pnand %p705_p3, %p699_p0 }
   0xb   :  { %709 = shalt.err (!%p706_p4)
}
   0xc   :  { %s777_s15 = smov 256   ;;  %s778_s16 = smov 16  }
   0xd   :  { %32 = dma.hbm_to_vmem [thread:$0]  %s829_s1, 32768, %s27_s13, [#allocation6], %s777_s15, %s777_s15, %s778_s16  }
   0xe   :  { %s779_s19 = smov [#allocation2]   ;;  %s780_s21 = smov [#allocation7]  }
   0xf   :  { %s17_s20 = sshll.u32 %s779_s19, 4  ;;  %s38_s22 = sshll.u32 %s780_s21, 4  ;;  %s18_s20 = int_to_ptr.vmem [resolvable:$true] %s17_s20  ;;  %s39_s22 = int_to_ptr.vmem [resolvable:$true] %s38_s22 }
  0x10   :  { %s718_s23 = scalar_lea.vmem %s18_s20, 256  ;;  %p723_p6 = scmp.lt.s32.totalorder %s18_s20, %s18_s20 }
  0x11   :  { %p719_p5 = scmp.ne.s32.totalorder %s18_s20, %s718_s23  ;;  %p724_p7 = scmp.lt.s32.totalorder %s718_s23, %s718_s23 }
  0x13   :  { %p725_p8 = por %p724_p7, %p723_p6 }
  0x15   :  { %p726_p9 = pnand %p725_p8, %p719_p5 }
  0x17   :  { %729 = shalt.err (!%p726_p9)
}
  0x18   :  { %20 = dma.hbm_to_vmem [thread:$0]  %s828_s0, 256, %s18_s20, [#allocation3]  }
  0x19   :  { %s738_s26 = scalar_lea.vmem %s39_s22, 128  ;;  %p743_p11 = scmp.lt.s32.totalorder %s39_s22, %s39_s22 }
  0x1a   :  { %p739_p10 = scmp.ne.s32.totalorder %s39_s22, %s738_s26  ;;  %p744_p12 = scmp.lt.s32.totalorder %s738_s26, %s738_s26 }
  0x1c   :  { %p745_p13 = por %p744_p12, %p743_p11 }
  0x1e   :  { %p746_p0 = pnand %p745_p13, %p739_p10 }
  0x20   :  { %749 = shalt.err (!%p746_p0)
}
  0x21   :  { %s781_s1 = smov 32   ;;  %s782_s27 = smov 2  }
  0x22   :  { %44 = dma.hbm_to_vmem [thread:$0]  %s830_s2, 128, %s39_s22, [#allocation6], %s781_s1, %s781_s1, %s782_s27  }
  0x23   :  { %770 = dma.done.wait [#allocation3], 256  }
  0x24   :  { %771 = vsyncadd [#allocation3], 4294967040 }
  0x25   :  { %772 = dma.done.wait [#allocation6], 32896  }
  0x26   :  { %773 = vsyncadd [#allocation6], 4294934400  ;;  %v88_v0 = vld [vmem:[#allocation5 + $0xf8] sm:$0xff]  ;;  %v87_v1 = vld [vmem:[#allocation5 + $0xf0] sm:$0xff]  ;;  %s783_s0 = smov [#allocation8]  }
  0x27   :  { %v86_v2 = vld [vmem:[#allocation5 + $0xe8] sm:$0xff]  ;;  %121 = vmatprep.subr.mxu0 %v88_v0  ;;  %v85_v3 = vld [vmem:[#allocation5 + $0xe0] sm:$0xff]  ;;  %v84_v4 = vld [vmem:[#allocation5 + $0xd8] sm:$0xff]  ;;  %s672_s2 = sshll.u32 %s783_s0, 4  ;;  %s673_s2 = int_to_ptr.vmem [resolvable:$true] %s672_s2 }
  0x28   :  { %122 = vmatpush1.msra.mxu0 %v87_v1  ;;  %v83_v5 = vld [vmem:[#allocation5 + $0xd0] sm:$0xff]  ;;  %v82_v6 = vld [vmem:[#allocation5 + $0xc8] sm:$0xff]  ;;  %v81_v7 = vld [vmem:[#allocation5 + $0xc0] sm:$0xff]  ;;  %s750_s30 = scalar_lea.vmem %s673_s2, 256  ;;  %p755_p2 = scmp.lt.s32.totalorder %s673_s2, %s673_s2 }
  0x29   :  { %123 = vmatprep.subr.mxu0 %v86_v2  ;;  %v80_v8 = vld [vmem:[#allocation5 + $0xb8] sm:$0xff]  ;;  %v79_v9 = vld [vmem:[#allocation5 + $0xb0] sm:$0xff]  ;;  %v78_v10 = vld [vmem:[#allocation5 + $0xa8] sm:$0xff]  ;;  %p751_p1 = scmp.ne.s32.totalorder %s673_s2, %s750_s30  ;;  %p756_p3 = scmp.lt.s32.totalorder %s750_s30, %s750_s30 }
  0x2a   :  { %124 = vmatpush1.msra.mxu0 %v85_v3  ;;  %v77_v11 = vld [vmem:[#allocation5 + $0xa0] sm:$0xff]  ;;  %v76_v12 = vld [vmem:[#allocation5 + $0x98] sm:$0xff]  ;;  %v75_v13 = vld [vmem:[#allocation5 + $0x90] sm:$0xff] }
  0x2b   :  { %125 = vmatprep.subr.mxu0 %v84_v4  ;;  %v74_v14 = vld [vmem:[#allocation5 + $0x88] sm:$0xff]  ;;  %v73_v15 = vld [vmem:[#allocation5 + $0x80] sm:$0xff]  ;;  %v72_v16 = vld [vmem:[#allocation5 + $0x78] sm:$0xff]  ;;  %p757_p4 = por %p756_p3, %p755_p2 }
  0x2c   :  { %126 = vmatpush1.msra.mxu0 %v83_v5  ;;  %v71_v17 = vld [vmem:[#allocation5 + $0x70] sm:$0xff]  ;;  %v70_v18 = vld [vmem:[#allocation5 + $0x68] sm:$0xff]  ;;  %v69_v19 = vld [vmem:[#allocation5 + $0x60] sm:$0xff] }
  0x2d   :  { %127 = vmatprep.subr.mxu0 %v82_v6  ;;  %v68_v20 = vld [vmem:[#allocation5 + $0x58] sm:$0xff]  ;;  %v67_v21 = vld [vmem:[#allocation5 + $0x50] sm:$0xff]  ;;  %v66_v22 = vld [vmem:[#allocation5 + $0x48] sm:$0xff]  ;;  %p758_p5 = pnand %p757_p4, %p751_p1 }
  0x2e   :  { %128 = vmatpush1.msra.mxu0 %v81_v7  ;;  %v65_v23 = vld [vmem:[#allocation5 + $0x40] sm:$0xff]  ;;  %v64_v24 = vld [vmem:[#allocation5 + $0x38] sm:$0xff]  ;;  %v240_v27 = vld [vmem:[#allocation5 + $0x2f0] sm:$0xff] }
  0x2f   :  { %129 = vmatprep.subr.mxu0 %v80_v8  ;;  %v55_v25 = vld [vmem:[#allocation2 + $0x8] sm:$0xff]  ;;  %v239_v28 = vld [vmem:[#allocation5 + $0x2e8] sm:$0xff]  ;;  %v63_v29 = vld [vmem:[#allocation5 + $0x30] sm:$0xff] }
  0x30   :  { %130 = vmatpush1.msra.mxu0 %v79_v9  ;;  %185 = vmatprep.mubr.f32.mxu0 %v55_v25  ;;  %v241_v26 = vld [vmem:[#allocation5 + $0x2f8] sm:$0xff]  ;;  %v238_v30 = vld [vmem:[#allocation5 + $0x2e0] sm:$0xff]  ;;  %v62_v31 = vld [vmem:[#allocation5 + $0x28] sm:$0xff] }
  0x31   :  { %131 = vmatprep.subr.mxu0 %v78_v10  ;;  %274 = vmatprep.subr.mxu1 %v241_v26  ;;  %v237_v32 = vld [vmem:[#allocation5 + $0x2d8] sm:$0xff]  ;;  %v61_v33 = vld [vmem:[#allocation5 + $0x20] sm:$0xff]  ;;  %v236_v34 = vld [vmem:[#allocation5 + $0x2d0] sm:$0xff] }
  0x32   :  { %132 = vmatpush1.msra.mxu0 %v77_v11  ;;  %275 = vmatpush1.msra.mxu1 %v240_v27  ;;  %v60_v35 = vld [vmem:[#allocation5 + $0x18] sm:$0xff]  ;;  %v235_v36 = vld [vmem:[#allocation5 + $0x2c8] sm:$0xff]  ;;  %v59_v37 = vld [vmem:[#allocation5 + $0x10] sm:$0xff] }
  0x33   :  { %133 = vmatprep.subr.mxu0 %v76_v12  ;;  %276 = vmatprep.subr.mxu1 %v239_v28  ;;  %v234_v38 = vld [vmem:[#allocation5 + $0x2c0] sm:$0xff]  ;;  %v58_v39 = vld [vmem:[#allocation5 + $0x8] sm:$0xff]  ;;  %v233_v40 = vld [vmem:[#allocation5 + $0x2b8] sm:$0xff] }
  0x34   :  { %134 = vmatpush1.msra.mxu0 %v75_v13  ;;  %277 = vmatpush1.msra.mxu1 %v238_v30  ;;  %v57_v41 = vld [vmem:[#allocation5] sm:$0xff]  ;;  %v232_v42 = vld [vmem:[#allocation5 + $0x2b0] sm:$0xff]  ;;  %v120_v43 = vld [vmem:[#allocation5 + $0x1f8] sm:$0xff] }
  0x35   :  { %135 = vmatprep.subr.mxu0 %v74_v14  ;;  %278 = vmatprep.subr.mxu1 %v237_v32  ;;  %v231_v44 = vld [vmem:[#allocation5 + $0x2a8] sm:$0xff]  ;;  %v119_v45 = vld [vmem:[#allocation5 + $0x1f0] sm:$0xff]  ;;  %v230_v46 = vld [vmem:[#allocation5 + $0x2a0] sm:$0xff] }
  0x36   :  { %136 = vmatpush1.msra.mxu0 %v73_v15  ;;  %279 = vmatpush1.msra.mxu1 %v236_v34  ;;  %v118_v47 = vld [vmem:[#allocation5 + $0x1e8] sm:$0xff]  ;;  %v229_v48 = vld [vmem:[#allocation5 + $0x298] sm:$0xff]  ;;  %v117_v49 = vld [vmem:[#allocation5 + $0x1e0] sm:$0xff] }
  0x37   :  { %137 = vmatprep.subr.mxu0 %v72_v16  ;;  %280 = vmatprep.subr.mxu1 %v235_v36  ;;  %v228_v50 = vld [vmem:[#allocation5 + $0x290] sm:$0xff]  ;;  %v116_v51 = vld [vmem:[#allocation5 + $0x1d8] sm:$0xff]  ;;  %v227_v52 = vld [vmem:[#allocation5 + $0x288] sm:$0xff] }
  0x38   :  { %138 = vmatpush1.msra.mxu0 %v71_v17  ;;  %281 = vmatpush1.msra.mxu1 %v234_v38  ;;  %v115_v53 = vld [vmem:[#allocation5 + $0x1d0] sm:$0xff]  ;;  %v226_v54 = vld [vmem:[#allocation5 + $0x280] sm:$0xff]  ;;  %v114_v55 = vld [vmem:[#allocation5 + $0x1c8] sm:$0xff] }
  0x39   :  { %139 = vmatprep.subr.mxu0 %v70_v18  ;;  %282 = vmatprep.subr.mxu1 %v233_v40  ;;  %v225_v56 = vld [vmem:[#allocation5 + $0x278] sm:$0xff]  ;;  %v113_v57 = vld [vmem:[#allocation5 + $0x1c0] sm:$0xff]  ;;  %v224_v58 = vld [vmem:[#allocation5 + $0x270] sm:$0xff] }
  0x3a   :  { %140 = vmatpush1.msra.mxu0 %v69_v19  ;;  %283 = vmatpush1.msra.mxu1 %v232_v42  ;;  %v112_v59 = vld [vmem:[#allocation5 + $0x1b8] sm:$0xff]  ;;  %v223_v60 = vld [vmem:[#allocation5 + $0x268] sm:$0xff]  ;;  %v111_v61 = vld [vmem:[#allocation5 + $0x1b0] sm:$0xff] }
  0x3b   :  { %141 = vmatprep.subr.mxu0 %v68_v20  ;;  %284 = vmatprep.subr.mxu1 %v231_v44  ;;  %v222_v62 = vld [vmem:[#allocation5 + $0x260] sm:$0xff]  ;;  %v110_v63 = vld [vmem:[#allocation5 + $0x1a8] sm:$0xff]  ;;  %v221_v0 = vld [vmem:[#allocation5 + $0x258] sm:$0xff] }
  0x3c   :  { %142 = vmatpush1.msra.mxu0 %v67_v21  ;;  %285 = vmatpush1.msra.mxu1 %v230_v46  ;;  %v109_v1 = vld [vmem:[#allocation5 + $0x1a0] sm:$0xff]  ;;  %v220_v2 = vld [vmem:[#allocation5 + $0x250] sm:$0xff]  ;;  %v108_v3 = vld [vmem:[#allocation5 + $0x198] sm:$0xff] }
  0x3d   :  { %143 = vmatprep.subr.mxu0 %v66_v22  ;;  %286 = vmatprep.subr.mxu1 %v229_v48  ;;  %v219_v4 = vld [vmem:[#allocation5 + $0x248] sm:$0xff]  ;;  %v107_v5 = vld [vmem:[#allocation5 + $0x190] sm:$0xff]  ;;  %v218_v6 = vld [vmem:[#allocation5 + $0x240] sm:$0xff] }
  0x3e   :  { %144 = vmatpush1.msra.mxu0 %v65_v23  ;;  %287 = vmatpush1.msra.mxu1 %v228_v50  ;;  %v106_v7 = vld [vmem:[#allocation5 + $0x188] sm:$0xff]  ;;  %v217_v8 = vld [vmem:[#allocation5 + $0x238] sm:$0xff]  ;;  %v105_v9 = vld [vmem:[#allocation5 + $0x180] sm:$0xff] }
  0x3f   :  { %145 = vmatprep.subr.mxu0 %v64_v24  ;;  %288 = vmatprep.subr.mxu1 %v227_v52  ;;  %v216_v10 = vld [vmem:[#allocation5 + $0x230] sm:$0xff]  ;;  %v104_v11 = vld [vmem:[#allocation5 + $0x178] sm:$0xff]  ;;  %v215_v12 = vld [vmem:[#allocation5 + $0x228] sm:$0xff] }
  0x40   :  { %146 = vmatpush1.msra.mxu0 %v63_v29  ;;  %289 = vmatpush1.msra.mxu1 %v226_v54  ;;  %v103_v13 = vld [vmem:[#allocation5 + $0x170] sm:$0xff]  ;;  %v214_v14 = vld [vmem:[#allocation5 + $0x220] sm:$0xff]  ;;  %v102_v15 = vld [vmem:[#allocation5 + $0x168] sm:$0xff] }
  0x41   :  { %147 = vmatprep.subr.mxu0 %v62_v31  ;;  %290 = vmatprep.subr.mxu1 %v225_v56  ;;  %v213_v16 = vld [vmem:[#allocation5 + $0x218] sm:$0xff]  ;;  %v101_v17 = vld [vmem:[#allocation5 + $0x160] sm:$0xff]  ;;  %v212_v18 = vld [vmem:[#allocation5 + $0x210] sm:$0xff] }
  0x42   :  { %148 = vmatpush1.msra.mxu0 %v61_v33  ;;  %291 = vmatpush1.msra.mxu1 %v224_v58  ;;  %v100_v19 = vld [vmem:[#allocation5 + $0x158] sm:$0xff]  ;;  %v211_v20 = vld [vmem:[#allocation5 + $0x208] sm:$0xff]  ;;  %v99_v21 = vld [vmem:[#allocation5 + $0x150] sm:$0xff] }
  0x43   :  { %149 = vmatprep.subr.mxu0 %v60_v35  ;;  %292 = vmatprep.subr.mxu1 %v223_v60  ;;  %v210_v22 = vld [vmem:[#allocation5 + $0x200] sm:$0xff]  ;;  %v98_v23 = vld [vmem:[#allocation5 + $0x148] sm:$0xff]  ;;  %v273_v24 = vld [vmem:[#allocation5 + $0x3f8] sm:$0xff] }
  0x44   :  { %150 = vmatpush1.msra.mxu0 %v59_v37  ;;  %293 = vmatpush1.msra.mxu1 %v222_v62  ;;  %v97_v25 = vld [vmem:[#allocation5 + $0x140] sm:$0xff]  ;;  %v272_v26 = vld [vmem:[#allocation5 + $0x3f0] sm:$0xff]  ;;  %v96_v27 = vld [vmem:[#allocation5 + $0x138] sm:$0xff] }
  0x45   :  { %151 = vmatprep.subr.mxu0 %v58_v39  ;;  %294 = vmatprep.subr.mxu1 %v221_v0  ;;  %v271_v28 = vld [vmem:[#allocation5 + $0x3e8] sm:$0xff]  ;;  %v95_v29 = vld [vmem:[#allocation5 + $0x130] sm:$0xff]  ;;  %v270_v30 = vld [vmem:[#allocation5 + $0x3e0] sm:$0xff] }
  0x46   :  { %152 = vmatpush1.msra.mxu0 %v57_v41  ;;  %295 = vmatpush1.msra.mxu1 %v220_v2  ;;  %v94_v31 = vld [vmem:[#allocation5 + $0x128] sm:$0xff]  ;;  %v269_v32 = vld [vmem:[#allocation5 + $0x3d8] sm:$0xff]  ;;  %v93_v33 = vld [vmem:[#allocation5 + $0x120] sm:$0xff] }
  0x47   :  { %153 = vmatprep.subr.mxu0 %v120_v43  ;;  %296 = vmatprep.subr.mxu1 %v219_v4  ;;  %v268_v34 = vld [vmem:[#allocation5 + $0x3d0] sm:$0xff]  ;;  %v92_v35 = vld [vmem:[#allocation5 + $0x118] sm:$0xff]  ;;  %v267_v36 = vld [vmem:[#allocation5 + $0x3c8] sm:$0xff] }
  0x48   :  { %154 = vmatpush2.msra.mxu0 %v119_v45  ;;  %297 = vmatpush1.msra.mxu1 %v218_v6  ;;  %v91_v37 = vld [vmem:[#allocation5 + $0x110] sm:$0xff]  ;;  %v266_v38 = vld [vmem:[#allocation5 + $0x3c0] sm:$0xff]  ;;  %v90_v39 = vld [vmem:[#allocation5 + $0x108] sm:$0xff] }
  0x49   :  { %155 = vmatprep.subr.mxu0 %v118_v47  ;;  %298 = vmatprep.subr.mxu1 %v217_v8  ;;  %v265_v40 = vld [vmem:[#allocation5 + $0x3b8] sm:$0xff]  ;;  %v89_v41 = vld [vmem:[#allocation5 + $0x100] sm:$0xff]  ;;  %v264_v42 = vld [vmem:[#allocation5 + $0x3b0] sm:$0xff] }
  0x4a   :  { %156 = vmatpush2.msra.mxu0 %v117_v49  ;;  %299 = vmatpush1.msra.mxu1 %v216_v10  ;;  %v54_v43 = vld [vmem:[#allocation2] sm:$0xff]  ;;  %v263_v44 = vld [vmem:[#allocation5 + $0x3a8] sm:$0xff]  ;;  %v262_v45 = vld [vmem:[#allocation5 + $0x3a0] sm:$0xff] }
  0x4b   :  { %157 = vmatprep.subr.mxu0 %v116_v51  ;;  %300 = vmatprep.subr.mxu1 %v215_v12  ;;  %v261_v46 = vld [vmem:[#allocation5 + $0x398] sm:$0xff]  ;;  %v260_v47 = vld [vmem:[#allocation5 + $0x390] sm:$0xff]  ;;  %v259_v48 = vld [vmem:[#allocation5 + $0x388] sm:$0xff] }
  0x4c   :  { %158 = vmatpush2.msra.mxu0 %v115_v53  ;;  %301 = vmatpush1.msra.mxu1 %v214_v14  ;;  %v258_v49 = vld [vmem:[#allocation5 + $0x380] sm:$0xff]  ;;  %v257_v50 = vld [vmem:[#allocation5 + $0x378] sm:$0xff]  ;;  %v256_v51 = vld [vmem:[#allocation5 + $0x370] sm:$0xff] }
  0x4d   :  { %159 = vmatprep.subr.mxu0 %v114_v55  ;;  %302 = vmatprep.subr.mxu1 %v213_v16  ;;  %v255_v52 = vld [vmem:[#allocation5 + $0x368] sm:$0xff]  ;;  %v254_v53 = vld [vmem:[#allocation5 + $0x360] sm:$0xff]  ;;  %v253_v54 = vld [vmem:[#allocation5 + $0x358] sm:$0xff] }
  0x4e   :  { %160 = vmatpush2.msra.mxu0 %v113_v57  ;;  %303 = vmatpush1.msra.mxu1 %v212_v18  ;;  %v252_v55 = vld [vmem:[#allocation5 + $0x350] sm:$0xff]  ;;  %v251_v56 = vld [vmem:[#allocation5 + $0x348] sm:$0xff]  ;;  %v250_v57 = vld [vmem:[#allocation5 + $0x340] sm:$0xff] }
  0x4f   :  { %161 = vmatprep.subr.mxu0 %v112_v59  ;;  %304 = vmatprep.subr.mxu1 %v211_v20  ;;  %v249_v58 = vld [vmem:[#allocation5 + $0x338] sm:$0xff]  ;;  %v248_v59 = vld [vmem:[#allocation5 + $0x330] sm:$0xff]  ;;  %v247_v60 = vld [vmem:[#allocation5 + $0x328] sm:$0xff] }
  0x50   :  { %162 = vmatpush2.msra.mxu0 %v111_v61  ;;  %305 = vmatpush1.msra.mxu1 %v210_v22  ;;  %v246_v61 = vld [vmem:[#allocation5 + $0x320] sm:$0xff]  ;;  %v245_v62 = vld [vmem:[#allocation5 + $0x318] sm:$0xff]  ;;  %v243_v0 = vld [vmem:[#allocation5 + $0x308] sm:$0xff] }
  0x51   :  { %163 = vmatprep.subr.mxu0 %v110_v63  ;;  %306 = vmatprep.subr.mxu1 %v273_v24  ;;  %v244_v63 = vld [vmem:[#allocation5 + $0x310] sm:$0xff]  ;;  %v394_v2 = vld [vmem:[#allocation5 + $0x4f8] sm:$0xff]  ;;  %v392_v4 = vld [vmem:[#allocation5 + $0x4e8] sm:$0xff] }
  0x52   :  { %164 = vmatpush2.msra.mxu0 %v109_v1  ;;  %307 = vmatpush2.msra.mxu1 %v272_v26  ;;  %v242_v1 = vld [vmem:[#allocation5 + $0x300] sm:$0xff]  ;;  %v390_v6 = vld [vmem:[#allocation5 + $0x4d8] sm:$0xff]  ;;  %v388_v8 = vld [vmem:[#allocation5 + $0x4c8] sm:$0xff] }
  0x53   :  { %165 = vmatprep.subr.mxu0 %v108_v3  ;;  %308 = vmatprep.subr.mxu1 %v271_v28  ;;  %v393_v3 = vld [vmem:[#allocation5 + $0x4f0] sm:$0xff]  ;;  %v386_v10 = vld [vmem:[#allocation5 + $0x4b8] sm:$0xff]  ;;  %v384_v12 = vld [vmem:[#allocation5 + $0x4a8] sm:$0xff] }
  0x54   :  { %166 = vmatpush2.msra.mxu0 %v107_v5  ;;  %309 = vmatpush2.msra.mxu1 %v270_v30  ;;  %v391_v5 = vld [vmem:[#allocation5 + $0x4e0] sm:$0xff]  ;;  %v382_v14 = vld [vmem:[#allocation5 + $0x498] sm:$0xff]  ;;  %v380_v16 = vld [vmem:[#allocation5 + $0x488] sm:$0xff] }
  0x55   :  { %167 = vmatprep.subr.mxu0 %v106_v7  ;;  %310 = vmatprep.subr.mxu1 %v269_v32  ;;  %v389_v7 = vld [vmem:[#allocation5 + $0x4d0] sm:$0xff]  ;;  %v378_v18 = vld [vmem:[#allocation5 + $0x478] sm:$0xff]  ;;  %v376_v20 = vld [vmem:[#allocation5 + $0x468] sm:$0xff] }
  0x56   :  { %168 = vmatpush2.msra.mxu0 %v105_v9  ;;  %311 = vmatpush2.msra.mxu1 %v268_v34  ;;  %v387_v9 = vld [vmem:[#allocation5 + $0x4c0] sm:$0xff]  ;;  %v374_v22 = vld [vmem:[#allocation5 + $0x458] sm:$0xff]  ;;  %v372_v24 = vld [vmem:[#allocation5 + $0x448] sm:$0xff] }
  0x57   :  { %169 = vmatprep.subr.mxu0 %v104_v11  ;;  %312 = vmatprep.subr.mxu1 %v267_v36  ;;  %v385_v11 = vld [vmem:[#allocation5 + $0x4b0] sm:$0xff]  ;;  %v370_v26 = vld [vmem:[#allocation5 + $0x438] sm:$0xff]  ;;  %v368_v28 = vld [vmem:[#allocation5 + $0x428] sm:$0xff] }
  0x58   :  { %170 = vmatpush2.msra.mxu0 %v103_v13  ;;  %313 = vmatpush2.msra.mxu1 %v266_v38  ;;  %v383_v13 = vld [vmem:[#allocation5 + $0x4a0] sm:$0xff]  ;;  %v366_v30 = vld [vmem:[#allocation5 + $0x418] sm:$0xff]  ;;  %v364_v32 = vld [vmem:[#allocation5 + $0x408] sm:$0xff] }
  0x59   :  { %171 = vmatprep.subr.mxu0 %v102_v15  ;;  %314 = vmatprep.subr.mxu1 %v265_v40  ;;  %v381_v15 = vld [vmem:[#allocation5 + $0x490] sm:$0xff]  ;;  %v426_v34 = vld [vmem:[#allocation5 + $0x5f8] sm:$0xff]  ;;  %v424_v36 = vld [vmem:[#allocation5 + $0x5e8] sm:$0xff] }
  0x5a   :  { %172 = vmatpush2.msra.mxu0 %v101_v17  ;;  %315 = vmatpush2.msra.mxu1 %v264_v42  ;;  %v379_v17 = vld [vmem:[#allocation5 + $0x480] sm:$0xff]  ;;  %v422_v38 = vld [vmem:[#allocation5 + $0x5d8] sm:$0xff]  ;;  %v420_v40 = vld [vmem:[#allocation5 + $0x5c8] sm:$0xff] }
  0x5b   :  { %173 = vmatprep.subr.mxu0 %v100_v19  ;;  %316 = vmatprep.subr.mxu1 %v263_v44  ;;  %v377_v19 = vld [vmem:[#allocation5 + $0x470] sm:$0xff]  ;;  %v418_v42 = vld [vmem:[#allocation5 + $0x5b8] sm:$0xff]  ;;  %v416_v44 = vld [vmem:[#allocation5 + $0x5a8] sm:$0xff] }
  0x5c   :  { %174 = vmatpush2.msra.mxu0 %v99_v21  ;;  %317 = vmatpush2.msra.mxu1 %v262_v45  ;;  %v375_v21 = vld [vmem:[#allocation5 + $0x460] sm:$0xff] }
  0x5d   :  { %175 = vmatprep.subr.mxu0 %v98_v23  ;;  %318 = vmatprep.subr.mxu1 %v261_v46  ;;  %v373_v23 = vld [vmem:[#allocation5 + $0x450] sm:$0xff]  ;;  %v415_v45 = vld [vmem:[#allocation5 + $0x5a0] sm:$0xff]  ;;  %v414_v46 = vld [vmem:[#allocation5 + $0x598] sm:$0xff] }
  0x5e   :  { %176 = vmatpush2.msra.mxu0 %v97_v25  ;;  %319 = vmatpush2.msra.mxu1 %v260_v47  ;;  %v371_v25 = vld [vmem:[#allocation5 + $0x440] sm:$0xff]  ;;  %v413_v47 = vld [vmem:[#allocation5 + $0x590] sm:$0xff] }
  0x5f   :  { %177 = vmatprep.subr.mxu0 %v96_v27  ;;  %320 = vmatprep.subr.mxu1 %v259_v48  ;;  %v369_v27 = vld [vmem:[#allocation5 + $0x430] sm:$0xff]  ;;  %v412_v48 = vld [vmem:[#allocation5 + $0x588] sm:$0xff] }
  0x60   :  { %178 = vmatpush2.msra.mxu0 %v95_v29  ;;  %321 = vmatpush2.msra.mxu1 %v258_v49  ;;  %v367_v29 = vld [vmem:[#allocation5 + $0x420] sm:$0xff] }
  0x61   :  { %179 = vmatprep.subr.mxu0 %v94_v31  ;;  %322 = vmatprep.subr.mxu1 %v257_v50  ;;  %v365_v31 = vld [vmem:[#allocation5 + $0x410] sm:$0xff]  ;;  %v411_v49 = vld [vmem:[#allocation5 + $0x580] sm:$0xff]  ;;  %v410_v50 = vld [vmem:[#allocation5 + $0x578] sm:$0xff] }
  0x62   :  { %180 = vmatpush2.msra.mxu0 %v93_v33  ;;  %323 = vmatpush2.msra.mxu1 %v256_v51  ;;  %v363_v33 = vld [vmem:[#allocation5 + $0x400] sm:$0xff]  ;;  %v409_v51 = vld [vmem:[#allocation5 + $0x570] sm:$0xff] }
  0x63   :  { %181 = vmatprep.subr.mxu0 %v92_v35  ;;  %324 = vmatprep.subr.mxu1 %v255_v52  ;;  %v425_v35 = vld [vmem:[#allocation5 + $0x5f0] sm:$0xff]  ;;  %v408_v52 = vld [vmem:[#allocation5 + $0x568] sm:$0xff] }
  0x64   :  { %182 = vmatpush2.msra.mxu0 %v91_v37  ;;  %325 = vmatpush2.msra.mxu1 %v254_v53  ;;  %v423_v37 = vld [vmem:[#allocation5 + $0x5e0] sm:$0xff] }
  0x65   :  { %183 = vmatprep.subr.mxu0 %v90_v39  ;;  %326 = vmatprep.subr.mxu1 %v253_v54  ;;  %v421_v39 = vld [vmem:[#allocation5 + $0x5d0] sm:$0xff]  ;;  %v407_v53 = vld [vmem:[#allocation5 + $0x560] sm:$0xff]  ;;  %v406_v54 = vld [vmem:[#allocation5 + $0x558] sm:$0xff] }
  0x66   :  { %184 = vmatpush2.msra.mxu0 %v89_v41  ;;  %327 = vmatpush2.msra.mxu1 %v252_v55  ;;  %v419_v41 = vld [vmem:[#allocation5 + $0x5c0] sm:$0xff]  ;;  %v405_v55 = vld [vmem:[#allocation5 + $0x550] sm:$0xff] }
  0x67   :  { %186 = vmatmul.mubr.f32.vlgmr.msra.gmra.mxu0 %v54_v43  ;;  %328 = vmatprep.subr.mxu1 %v251_v56  ;;  %v417_v43 = vld [vmem:[#allocation5 + $0x5b0] sm:$0xff]  ;;  %v404_v56 = vld [vmem:[#allocation5 + $0x548] sm:$0xff] }
  0x68   :  { %329 = vmatpush2.msra.mxu1 %v250_v57  ;;  %427 = vmatprep.subr.mxu0 %v394_v2  ;;  %v403_v57 = vld [vmem:[#allocation5 + $0x540] sm:$0xff] }
  0x69   :  { %330 = vmatprep.subr.mxu1 %v249_v58  ;;  %428 = vmatpush1.msra.mxu0 %v393_v3  ;;  %v193_v58 = vlaneseq }
  0x6a   :  { %331 = vmatpush2.msra.mxu1 %v248_v59  ;;  %429 = vmatprep.subr.mxu0 %v392_v4 }
  0x6b   :  { %332 = vmatprep.subr.mxu1 %v247_v60  ;;  %430 = vmatpush1.msra.mxu0 %v391_v5  ;;  %v194_v59 = vshrl.u32 %v193_v58, 7  ;;  %v568_v58 = vld [vmem:[#allocation5 + $0x7a0] sm:$0xff] }
  0x6c   :  { %333 = vmatpush2.msra.mxu1 %v246_v61  ;;  %431 = vmatprep.subr.mxu0 %v390_v6  ;;  %v56_v61 = vld [vmem:[#allocation7] sm:$0x3] }
  0x6d   :  { %334 = vmatprep.subr.mxu1 %v245_v62  ;;  %432 = vmatpush1.msra.mxu0 %v389_v7  ;;  %v813_v60 = vsub.s32 0, %v194_v59  ;;  %v815_v62 = vsub.s32 1, %v194_v59  ;;  %v402_v7 = vld [vmem:[#allocation5 + $0x538] sm:$0xff] }
  0x6e   :  { %335 = vmatpush2.msra.mxu1 %v244_v63  ;;  %433 = vmatprep.subr.mxu0 %v388_v8  ;;  %v401_v8 = vld [vmem:[#allocation5 + $0x530] sm:$0xff]  ;;  %v567_v59 = vld [vmem:[#allocation5 + $0x798] sm:$0xff] }
  0x6f   :  { %336 = vmatprep.subr.mxu1 %v243_v0  ;;  %434 = vmatpush1.msra.mxu0 %v387_v9  ;;  %v196_v63 = vrot.slane %v56_v61, %v813_v60  ;;  %v200_v0 = vrot.slane %v56_v61, %v815_v62  ;;  %v400_v9 = vld [vmem:[#allocation5 + $0x528] sm:$0xff]  ;;  %v566_v61 = vld [vmem:[#allocation5 + $0x790] sm:$0xff] }
  0x70   :  { %337 = vmatpush2.msra.mxu1 %v242_v1  ;;  %435 = vmatprep.subr.mxu0 %v386_v10  ;;  %v399_v10 = vld [vmem:[#allocation5 + $0x520] sm:$0xff] }
  0x71   :  { %436 = vmatpush1.msra.mxu0 %v385_v11  ;;  %v398_v11 = vld [vmem:[#allocation5 + $0x518] sm:$0xff] }
  0x72   :  { %437 = vmatprep.subr.mxu0 %v384_v12  ;;  %v397_v12 = vld [vmem:[#allocation5 + $0x510] sm:$0xff] }
  0x73   :  { %438 = vmatpush1.msra.mxu0 %v383_v13  ;;  %v396_v13 = vld [vmem:[#allocation5 + $0x508] sm:$0xff] }
  0x74   :  { %439 = vmatprep.subr.mxu0 %v382_v14  ;;  %v395_v14 = vld [vmem:[#allocation5 + $0x500] sm:$0xff] }
  0x75   :  { %440 = vmatpush1.msra.mxu0 %v381_v15  ;;  %v547_v15 = vld [vmem:[#allocation5 + $0x6f8] sm:$0xff] }
  0x76   :  { %441 = vmatprep.subr.mxu0 %v380_v16  ;;  %v546_v16 = vld [vmem:[#allocation5 + $0x6f0] sm:$0xff]  ;;  %580 = vmatprep.subr.mxu1 %v547_v15 }
  0x77   :  { %442 = vmatpush1.msra.mxu0 %v379_v17  ;;  %v545_v17 = vld [vmem:[#allocation5 + $0x6e8] sm:$0xff] }
  0x78   :  { %443 = vmatprep.subr.mxu0 %v378_v18  ;;  %v544_v18 = vld [vmem:[#allocation5 + $0x6e0] sm:$0xff] }
  0x79   :  { %444 = vmatpush1.msra.mxu0 %v377_v19  ;;  %v543_v19 = vld [vmem:[#allocation5 + $0x6d8] sm:$0xff] }
  0x7a   :  { %445 = vmatprep.subr.mxu0 %v376_v20  ;;  %v542_v20 = vld [vmem:[#allocation5 + $0x6d0] sm:$0xff] }
  0x7b   :  { %446 = vmatpush1.msra.mxu0 %v375_v21  ;;  %v541_v21 = vld [vmem:[#allocation5 + $0x6c8] sm:$0xff] }
  0x7c   :  { %447 = vmatprep.subr.mxu0 %v374_v22  ;;  %v540_v22 = vld [vmem:[#allocation5 + $0x6c0] sm:$0xff] }
  0x7d   :  { %448 = vmatpush1.msra.mxu0 %v373_v23  ;;  %v539_v23 = vld [vmem:[#allocation5 + $0x6b8] sm:$0xff] }
  0x7e   :  { %449 = vmatprep.subr.mxu0 %v372_v24  ;;  %v538_v24 = vld [vmem:[#allocation5 + $0x6b0] sm:$0xff] }
  0x7f   :  { %450 = vmatpush1.msra.mxu0 %v371_v25  ;;  %v537_v25 = vld [vmem:[#allocation5 + $0x6a8] sm:$0xff] }
  0x80   :  { %451 = vmatprep.subr.mxu0 %v370_v26  ;;  %v536_v26 = vld [vmem:[#allocation5 + $0x6a0] sm:$0xff] }
  0x81   :  { %452 = vmatpush1.msra.mxu0 %v369_v27  ;;  %v535_v27 = vld [vmem:[#allocation5 + $0x698] sm:$0xff] }
  0x82   :  { %453 = vmatprep.subr.mxu0 %v368_v28  ;;  %v534_v28 = vld [vmem:[#allocation5 + $0x690] sm:$0xff] }
  0x83   :  { %454 = vmatpush1.msra.mxu0 %v367_v29  ;;  %v533_v29 = vld [vmem:[#allocation5 + $0x688] sm:$0xff] }
  0x84   :  { %455 = vmatprep.subr.mxu0 %v366_v30  ;;  %v532_v30 = vld [vmem:[#allocation5 + $0x680] sm:$0xff] }
  0x85   :  { %456 = vmatpush1.msra.mxu0 %v365_v31  ;;  %v531_v31 = vld [vmem:[#allocation5 + $0x678] sm:$0xff] }
  0x86   :  { %457 = vmatprep.subr.mxu0 %v364_v32  ;;  %v530_v32 = vld [vmem:[#allocation5 + $0x670] sm:$0xff] }
  0x87   :  { %458 = vmatpush1.msra.mxu0 %v363_v33  ;;  %v529_v33 = vld [vmem:[#allocation5 + $0x668] sm:$0xff] }
  0x88   :  { %459 = vmatprep.subr.mxu0 %v426_v34  ;;  %v528_v34 = vld [vmem:[#allocation5 + $0x660] sm:$0xff] }
  0x89   :  { %460 = vmatpush2.msra.mxu0 %v425_v35  ;;  %v527_v35 = vld [vmem:[#allocation5 + $0x658] sm:$0xff] }
  0x8a   :  { %461 = vmatprep.subr.mxu0 %v424_v36  ;;  %v526_v36 = vld [vmem:[#allocation5 + $0x650] sm:$0xff] }
  0x8b   :  { %462 = vmatpush2.msra.mxu0 %v423_v37  ;;  %v525_v37 = vld [vmem:[#allocation5 + $0x648] sm:$0xff] }
  0x8c   :  { %463 = vmatprep.subr.mxu0 %v422_v38  ;;  %v524_v38 = vld [vmem:[#allocation5 + $0x640] sm:$0xff] }
  0x8d   :  { %464 = vmatpush2.msra.mxu0 %v421_v39  ;;  %v523_v39 = vld [vmem:[#allocation5 + $0x638] sm:$0xff] }
  0x8e   :  { %465 = vmatprep.subr.mxu0 %v420_v40  ;;  %v522_v40 = vld [vmem:[#allocation5 + $0x630] sm:$0xff] }
  0x8f   :  { %466 = vmatpush2.msra.mxu0 %v419_v41  ;;  %v521_v41 = vld [vmem:[#allocation5 + $0x628] sm:$0xff] }
  0x90   :  { %467 = vmatprep.subr.mxu0 %v418_v42  ;;  %v520_v42 = vld [vmem:[#allocation5 + $0x620] sm:$0xff] }
  0x91   :  { %468 = vmatpush2.msra.mxu0 %v417_v43  ;;  %v519_v43 = vld [vmem:[#allocation5 + $0x618] sm:$0xff] }
  0x92   :  { %469 = vmatprep.subr.mxu0 %v416_v44  ;;  %v518_v44 = vld [vmem:[#allocation5 + $0x610] sm:$0xff] }
  0x93   :  { %470 = vmatpush2.msra.mxu0 %v415_v45  ;;  %v517_v45 = vld [vmem:[#allocation5 + $0x608] sm:$0xff] }
  0x94   :  { %471 = vmatprep.subr.mxu0 %v414_v46  ;;  %v516_v46 = vld [vmem:[#allocation5 + $0x600] sm:$0xff] }
  0x95   :  { %472 = vmatpush2.msra.mxu0 %v413_v47  ;;  %v579_v47 = vld [vmem:[#allocation5 + $0x7f8] sm:$0xff] }
  0x96   :  { %473 = vmatprep.subr.mxu0 %v412_v48  ;;  %v578_v48 = vld [vmem:[#allocation5 + $0x7f0] sm:$0xff] }
  0x97   :  { %474 = vmatpush2.msra.mxu0 %v411_v49  ;;  %v577_v49 = vld [vmem:[#allocation5 + $0x7e8] sm:$0xff] }
  0x98   :  { %475 = vmatprep.subr.mxu0 %v410_v50  ;;  %v576_v50 = vld [vmem:[#allocation5 + $0x7e0] sm:$0xff] }
  0x99   :  { %476 = vmatpush2.msra.mxu0 %v409_v51  ;;  %v575_v51 = vld [vmem:[#allocation5 + $0x7d8] sm:$0xff] }
  0x9a   :  { %477 = vmatprep.subr.mxu0 %v408_v52  ;;  %v574_v52 = vld [vmem:[#allocation5 + $0x7d0] sm:$0xff] }
  0x9b   :  { %478 = vmatpush2.msra.mxu0 %v407_v53  ;;  %v573_v53 = vld [vmem:[#allocation5 + $0x7c8] sm:$0xff] }
  0x9c   :  { %479 = vmatprep.subr.mxu0 %v406_v54  ;;  %v572_v54 = vld [vmem:[#allocation5 + $0x7c0] sm:$0xff] }
  0x9d   :  { %480 = vmatpush2.msra.mxu0 %v405_v55  ;;  %v571_v55 = vld [vmem:[#allocation5 + $0x7b8] sm:$0xff] }
  0x9e   :  { %481 = vmatprep.subr.mxu0 %v404_v56  ;;  %v570_v56 = vld [vmem:[#allocation5 + $0x7b0] sm:$0xff] }
  0x9f   :  { %482 = vmatpush2.msra.mxu0 %v403_v57  ;;  %v569_v57 = vld [vmem:[#allocation5 + $0x7a8] sm:$0xff] }
  0xa0   :  { %483 = vmatprep.subr.mxu0 %v402_v7  ;;  %v557_v7 = vld [vmem:[#allocation5 + $0x748] sm:$0xff] }
  0xa1   :  { %484 = vmatpush2.msra.mxu0 %v401_v8  ;;  %v556_v8 = vld [vmem:[#allocation5 + $0x740] sm:$0xff] }
  0xa2   :  { %485 = vmatprep.subr.mxu0 %v400_v9  ;;  %v208_v9 = vld [vmem:[#allocation7 + $0x2] sm:$0x3] }
  0xa3   :  { %486 = vmatpush2.msra.mxu0 %v399_v10  ;;  %v349_v10 = vrot.slane %v208_v9, %v813_v60 }
  0xa4   :  { %487 = vmatprep.subr.mxu0 %v398_v11  ;;  %v353_v11 = vrot.slane %v208_v9, %v815_v62 }
  0xa5   :  { %488 = vmatpush2.msra.mxu0 %v397_v12 }
  0xa6   :  { %489 = vmatprep.subr.mxu0 %v396_v13 }
  0xa7   :  { %490 = vmatpush2.msra.mxu0 %v395_v14 }
 0x127   :  { %v187_v1 = vpop.f32.mrf.mxu0 }
 0x128   :  { %v203_v2 = vadd.f32 %v196_v63, %v187_v1  ;;  %v565_v63 = vld [vmem:[#allocation5 + $0x788] sm:$0xff]  ;;  %v563_v1 = vld [vmem:[#allocation5 + $0x778] sm:$0xff] }
 0x129   :  { %v189_v3 = vpop.f32.mrf.mxu0 }
 0x12a   :  { %v204_v4 = vadd.f32 %v200_v0, %v189_v3  ;;  %v205_v6 = vmax.f32 %v203_v2, 0.0  ;;  %v564_v0 = vld [vmem:[#allocation5 + $0x780] sm:$0xff]  ;;  %v562_v2 = vld [vmem:[#allocation5 + $0x770] sm:$0xff]  ;;  %v561_v3 = vld [vmem:[#allocation5 + $0x768] sm:$0xff] }
 0x12c   :  { %v206_v5 = vmax.f32 %v204_v4, 0.0  ;;  %v560_v4 = vld [vmem:[#allocation5 + $0x760] sm:$0xff] }
 0x12e   :  { %338 = vmatprep.mubr.f32.mxu1 %v206_v5  ;;  %v559_v5 = vld [vmem:[#allocation5 + $0x758] sm:$0xff] }
 0x12f   :  { %339 = vmatmul.mubr.f32.vlgmr.msra.gmra.mxu1 %v205_v6  ;;  %v558_v6 = vld [vmem:[#allocation5 + $0x750] sm:$0xff] }
 0x130   :  { %581 = vmatpush1.msra.mxu1 %v546_v16 }
 0x131   :  { %582 = vmatprep.subr.mxu1 %v545_v17 }
 0x132   :  { %583 = vmatpush1.msra.mxu1 %v544_v18  ;;  %v555_v18 = vld [vmem:[#allocation5 + $0x738] sm:$0xff] }
 0x133   :  { %584 = vmatprep.subr.mxu1 %v543_v19  ;;  %v554_v19 = vld [vmem:[#allocation5 + $0x730] sm:$0xff] }
 0x134   :  { %585 = vmatpush1.msra.mxu1 %v542_v20  ;;  %v553_v20 = vld [vmem:[#allocation5 + $0x728] sm:$0xff] }
 0x135   :  { %586 = vmatprep.subr.mxu1 %v541_v21  ;;  %v552_v21 = vld [vmem:[#allocation5 + $0x720] sm:$0xff] }
 0x136   :  { %587 = vmatpush1.msra.mxu1 %v540_v22  ;;  %v551_v22 = vld [vmem:[#allocation5 + $0x718] sm:$0xff] }
 0x137   :  { %588 = vmatprep.subr.mxu1 %v539_v23  ;;  %v550_v23 = vld [vmem:[#allocation5 + $0x710] sm:$0xff] }
 0x138   :  { %589 = vmatpush1.msra.mxu1 %v538_v24  ;;  %v549_v24 = vld [vmem:[#allocation5 + $0x708] sm:$0xff] }
 0x139   :  { %590 = vmatprep.subr.mxu1 %v537_v25  ;;  %v548_v25 = vld [vmem:[#allocation5 + $0x700] sm:$0xff] }
 0x13a   :  { %591 = vmatpush1.msra.mxu1 %v536_v26  ;;  %v361_v26 = vld [vmem:[#allocation7 + $0x4] sm:$0x3] }
 0x13b   :  { %592 = vmatprep.subr.mxu1 %v535_v27  ;;  %v502_v27 = vrot.slane %v361_v26, %v813_v60 }
 0x13c   :  { %593 = vmatpush1.msra.mxu1 %v534_v28  ;;  %v506_v28 = vrot.slane %v361_v26, %v815_v62 }
 0x13d   :  { %594 = vmatprep.subr.mxu1 %v533_v29 }
 0x13e   :  { %595 = vmatpush1.msra.mxu1 %v532_v30 }
 0x13f   :  { %596 = vmatprep.subr.mxu1 %v531_v31 }
 0x140   :  { %597 = vmatpush1.msra.mxu1 %v530_v32 }
 0x141   :  { %598 = vmatprep.subr.mxu1 %v529_v33 }
 0x142   :  { %599 = vmatpush1.msra.mxu1 %v528_v34 }
 0x143   :  { %600 = vmatprep.subr.mxu1 %v527_v35  ;;  %v514_v35 = vld [vmem:[#allocation7 + $0x6] sm:$0x3] }
 0x144   :  { %601 = vmatpush1.msra.mxu1 %v526_v36  ;;  %v655_v36 = vrot.slane %v514_v35, %v813_v60 }
 0x145   :  { %602 = vmatprep.subr.mxu1 %v525_v37  ;;  %v659_v37 = vrot.slane %v514_v35, %v815_v62 }
 0x146   :  { %603 = vmatpush1.msra.mxu1 %v524_v38 }
 0x147   :  { %604 = vmatprep.subr.mxu1 %v523_v39 }
 0x148   :  { %605 = vmatpush1.msra.mxu1 %v522_v40 }
 0x149   :  { %606 = vmatprep.subr.mxu1 %v521_v41 }
 0x14a   :  { %607 = vmatpush1.msra.mxu1 %v520_v42 }
 0x14b   :  { %608 = vmatprep.subr.mxu1 %v519_v43 }
 0x14c   :  { %609 = vmatpush1.msra.mxu1 %v518_v44 }
 0x14d   :  { %610 = vmatprep.subr.mxu1 %v517_v45 }
 0x14e   :  { %611 = vmatpush1.msra.mxu1 %v516_v46 }
 0x14f   :  { %612 = vmatprep.subr.mxu1 %v579_v47 }
 0x150   :  { %613 = vmatpush2.msra.mxu1 %v578_v48 }
 0x151   :  { %614 = vmatprep.subr.mxu1 %v577_v49 }
 0x152   :  { %615 = vmatpush2.msra.mxu1 %v576_v50 }
 0x153   :  { %616 = vmatprep.subr.mxu1 %v575_v51 }
 0x154   :  { %617 = vmatpush2.msra.mxu1 %v574_v52 }
 0x155   :  { %618 = vmatprep.subr.mxu1 %v573_v53 }
 0x156   :  { %619 = vmatpush2.msra.mxu1 %v572_v54 }
 0x157   :  { %620 = vmatprep.subr.mxu1 %v571_v55 }
 0x158   :  { %621 = vmatpush2.msra.mxu1 %v570_v56 }
 0x159   :  { %622 = vmatprep.subr.mxu1 %v569_v57 }
 0x15a   :  { %623 = vmatpush2.msra.mxu1 %v568_v58 }
 0x15b   :  { %624 = vmatprep.subr.mxu1 %v567_v59 }
 0x15c   :  { %625 = vmatpush2.msra.mxu1 %v566_v61 }
 0x15d   :  { %626 = vmatprep.subr.mxu1 %v565_v63 }
 0x15e   :  { %627 = vmatpush2.msra.mxu1 %v564_v0 }
 0x15f   :  { %628 = vmatprep.subr.mxu1 %v563_v1 }
 0x160   :  { %629 = vmatpush2.msra.mxu1 %v562_v2 }
 0x161   :  { %630 = vmatprep.subr.mxu1 %v561_v3 }
 0x162   :  { %631 = vmatpush2.msra.mxu1 %v560_v4 }
 0x163   :  { %632 = vmatprep.subr.mxu1 %v559_v5 }
 0x164   :  { %633 = vmatpush2.msra.mxu1 %v558_v6 }
 0x165   :  { %634 = vmatprep.subr.mxu1 %v557_v7 }
 0x166   :  { %635 = vmatpush2.msra.mxu1 %v556_v8 }
 0x167   :  { %636 = vmatprep.subr.mxu1 %v555_v18 }
 0x168   :  { %637 = vmatpush2.msra.mxu1 %v554_v19 }
 0x169   :  { %638 = vmatprep.subr.mxu1 %v553_v20 }
 0x16a   :  { %639 = vmatpush2.msra.mxu1 %v552_v21 }
 0x16b   :  { %640 = vmatprep.subr.mxu1 %v551_v22 }
 0x16c   :  { %641 = vmatpush2.msra.mxu1 %v550_v23 }
 0x16d   :  { %642 = vmatprep.subr.mxu1 %v549_v24 }
 0x16e   :  { %643 = vmatpush2.msra.mxu1 %v548_v25 }
 0x1ef   :  { %v340_v12 = vpop.f32.mrf.mxu1 }
 0x1f0   :  { %v356_v13 = vadd.f32 %v349_v10, %v340_v12 }
 0x1f1   :  { %v342_v14 = vpop.f32.mrf.mxu1 }
 0x1f2   :  { %v357_v15 = vadd.f32 %v353_v11, %v342_v14  ;;  %v358_v17 = vmax.f32 %v356_v13, 0.0 }
 0x1f4   :  { %v359_v16 = vmax.f32 %v357_v15, 0.0 }
 0x1f6   :  { %491 = vmatprep.mubr.f32.mxu0 %v359_v16 }
 0x1f7   :  { %492 = vmatmul.mubr.f32.vlgmr.msra.gmra.mxu0 %v358_v17 }
 0x2b7   :  { %v493_v29 = vpop.f32.mrf.mxu0 }
 0x2b8   :  { %v509_v30 = vadd.f32 %v502_v27, %v493_v29 }
 0x2b9   :  { %v495_v31 = vpop.f32.mrf.mxu0 }
 0x2ba   :  { %v510_v32 = vadd.f32 %v506_v28, %v495_v31  ;;  %v511_v34 = vmax.f32 %v509_v30, 0.0 }
 0x2bc   :  { %v512_v33 = vmax.f32 %v510_v32, 0.0 }
 0x2be   :  { %644 = vmatprep.mubr.f32.mxu1 %v512_v33 }
 0x2bf   :  { %645 = vmatmul.mubr.f32.vlgmr.msra.gmra.mxu1 %v511_v34 }
 0x37f   :  { %v646_v38 = vpop.f32.mrf.mxu1 }
 0x380   :  { %v662_v39 = vadd.f32 %v655_v36, %v646_v38 }
 0x381   :  { %v648_v40 = vpop.f32.mrf.mxu1 }
 0x382   :  { %664 = vst [vmem:[#allocation8] sm:$0xff] %v662_v39  ;;  %v663_v41 = vadd.f32 %v659_v37, %v648_v40 }
 0x384   :  { %665 = vst [vmem:[#allocation8 + $0x8] sm:$0xff] %v663_v41 }
 0x385   :  { %761 = shalt.err (!%p758_p5)
}
 0x386   :  { %675 = dma.vmem_to_hbm [thread:$0]  %s673_s2, 256, %s831_s3, [#allocation4]  }
 0x387   :  { %774 = dma.done.wait [#allocation4], 256  }
 0x388   :  { %775 = vsyncadd [#allocation4], 4294967040 }
 0x389   :  { %679 = vsyncpa [#allocation3], 1 }
 0x38a   :  { %680 = vsyncpa [#allocation6], 1 }
 0x38b   :  { %681 = vsyncpa [#allocation4], 1 }

</bundles_post_ra>
